<compile_context>
chip_gen: v5e
topology: v5e:2x2
jax: 0.10.0
libtpu: 0.0.40
codegen_flags: <defaults>
</compile_context>

<pallas_src>
import functools
import math

import jax
import jax.numpy as jnp
from jax.experimental import pallas as pl
from jax.experimental.pallas import tpu as pltpu

_LANE = 128      # vreg lane width  — last-dim multiple
_SUBLANE = 8     # vreg sublane width — second-to-last-dim multiple


def _round_up(n, m):
    return ((n + m - 1) // m) * m


def _pad2d(a, rows, cols):
    r, c = a.shape
    return jnp.pad(a, ((0, rows - r), (0, cols - c)))


def _fused_mlp_kernel(*refs, num_linear: int):
    """One batch tile through the entire MLP.

    refs = (x_ref, w0, b0, w1, b1, ..., w[L-1], b[L-1], o_ref, h_scratch)
      x_ref : (tm, K0p)  bf16   (zero-padded input tile)
      w_i   : (Kip, Nip) bf16   (zero-padded, VMEM-resident across the grid)
      b_i   : (1, Nip)   f32    (zero-padded)
      o_ref : (tm, Np)   f32
      h_ref : (tm, Hp)   bf16   VMEM scratch for intermediate activations
    """
    x_ref = refs[0]
    o_ref = refs[1 + 2 * num_linear]
    h_ref = refs[2 + 2 * num_linear]

    for i in range(num_linear):
        w_ref = refs[1 + 2 * i]
        b_ref = refs[2 + 2 * i]
        a = x_ref[...] if i == 0 else h_ref[...]          # bf16 MXU input
        y = jnp.dot(a, w_ref[...], preferred_element_type=jnp.float32)
        y = y + b_ref[...]                                 # f32 bias broadcast
        if i < num_linear - 1:
            # ReLU then bf16 cast == bf16 cast then ReLU (monotone, preserves 0),
            # so storing the activation in bf16 loses nothing vs. the next matmul.
            h_ref[...] = jnp.maximum(y, 0.0).astype(h_ref.dtype)
        else:
            o_ref[...] = y.astype(o_ref.dtype)             # final layer: no ReLU


def mlp_forward(x, params):
    """x: [M, K] f32; params: list of (W [in, out] f32, b [out] f32) -> [M, out_dims]."""
    M, K = x.shape
    L = len(params)
    assert L >= 1

    hidden = params[0][0].shape[1]
    out_dims = params[-1][0].shape[1]
    # All intermediate outputs share one scratch width (true for this MLP).
    for w, _ in params[:-1]:
        assert w.shape[1] == hidden, "uniform hidden width expected"

    k0_p = _round_up(K, _LANE)
    h_p = _round_up(hidden, _LANE)
    out_p = _round_up(out_dims, _LANE)

    # Batch tiling: tiles of up to 512 rows (multiple of 8), "parallel" grid axis.
    m_tile = min(512, _round_up(M, _SUBLANE))
    m_pad = _round_up(M, m_tile)
    grid = (m_pad // m_tile,)

    # Pad + cast once in the wrapper (zero padding => padded lanes stay exactly 0).
    x_p = _pad2d(x, m_pad, k0_p).astype(jnp.bfloat16)
    flat_inputs = [x_p]
    in_specs = [pl.BlockSpec((m_tile, k0_p), lambda i: (i, 0))]
    for w, b in params:
        k_in, k_out = w.shape
        kin_p = _round_up(k_in, _LANE)
        kout_p = _round_up(k_out, _LANE)
        w_p = _pad2d(w, kin_p, kout_p).astype(jnp.bfloat16)
        b_p = jnp.pad(b, (0, kout_p - k_out)).reshape(1, kout_p).astype(jnp.float32)
        flat_inputs += [w_p, b_p]
        in_specs += [
            # Constant index_map -> weights/bias DMA'd once, VMEM-resident.
            pl.BlockSpec((kin_p, kout_p), lambda i: (0, 0)),
            pl.BlockSpec((1, kout_p), lambda i: (0, 0)),
        ]

    flops = 2 * m_pad * sum(
        _round_up(w.shape[0], _LANE) * _round_up(w.shape[1], _LANE) for w, _ in params
    )
    bytes_accessed = (
        sum(int(a.size) * a.dtype.itemsize for a in flat_inputs) + m_pad * out_p * 4
    )

    out_padded = pl.pallas_call(
        functools.partial(_fused_mlp_kernel, num_linear=L),
        out_shape=jax.ShapeDtypeStruct((m_pad, out_p), jnp.float32),
        grid=grid,
        in_specs=in_specs,
        out_specs=pl.BlockSpec((m_tile, out_p), lambda i: (i, 0)),
        scratch_shapes=[pltpu.VMEM((m_tile, h_p), jnp.bfloat16)],
        compiler_params=pltpu.CompilerParams(
            dimension_semantics=("parallel",),
        ),
        cost_estimate=pl.CostEstimate(
            flops=flops, transcendentals=0, bytes_accessed=bytes_accessed
        ),
    )(*flat_inputs)

    return out_padded[:M, :out_dims]


def init_mlp_params(key, input_dim, dim_hidden, num_layers, out_dims):
    """Deterministic init matching PyTorch nn.Linear default:
    U(-1/sqrt(fan_in), 1/sqrt(fan_in)) for weight and bias.
    Weights stored transposed as [in, out] so the kernel computes x @ W + b
    (PyTorch stores [out, in] and computes x @ W.T + b — identical math)."""
    dims = [input_dim] + [dim_hidden] * (num_layers + 1) + [out_dims]
    params = []
    for fan_in, fan_out in zip(dims[:-1], dims[1:]):
        key, kw, kb = jax.random.split(key, 3)
        bound = 1.0 / math.sqrt(fan_in)
        w = jax.random.uniform(kw, (fan_in, fan_out), jnp.float32, -bound, bound)
        b = jax.random.uniform(kb, (fan_out,), jnp.float32, -bound, bound)
        params.append((w, b))
    return params


if __name__ == "__main__":
    # Small shapes consistent with MLP(input_dim, dim_hidden, num_layers, out_dims)
    batch, input_dim, dim_hidden, num_layers, out_dims = 8, 16, 32, 2, 4

    key = jax.random.PRNGKey(0)
    key, kx = jax.random.split(key)
    x = jax.random.normal(kx, (batch, input_dim), dtype=jnp.float32)

    params = init_mlp_params(key, input_dim, dim_hidden, num_layers, out_dims)

    out = mlp_forward(x, params)
    jax.block_until_ready(out)

    # pure-JAX f32 reference of the exact PyTorch forward
    ref = x
    n = len(params)
    for i, (w, b) in enumerate(params):
        ref = ref @ w + b
        if i < n - 1:
            ref = jnp.maximum(ref, 0.0)

    assert out.shape == (batch, out_dims)
    # bf16 MXU inputs / bf16 intermediate activations with f32 accumulation
    # -> loosened tolerance vs the f32 reference.
    max_err = float(jnp.max(jnp.abs(out - ref)))
    assert jnp.allclose(out, ref, atol=5e-2, rtol=5e-2), f"max abs err {max_err}"

    print("KERNEL_OK")
</pallas_src>

<mosaic_0001>
module attributes {stable_mosaic.version = 11 : i64} {
  func.func @_fused_mlp_kernel(%arg0: i32, %arg1: memref<8x128xbf16, #tpu.memory_space<vmem>>, %arg2: memref<128x128xbf16, #tpu.memory_space<vmem>>, %arg3: memref<1x128xf32, #tpu.memory_space<vmem>>, %arg4: memref<128x128xbf16, #tpu.memory_space<vmem>>, %arg5: memref<1x128xf32, #tpu.memory_space<vmem>>, %arg6: memref<128x128xbf16, #tpu.memory_space<vmem>>, %arg7: memref<1x128xf32, #tpu.memory_space<vmem>>, %arg8: memref<128x128xbf16, #tpu.memory_space<vmem>>, %arg9: memref<1x128xf32, #tpu.memory_space<vmem>>, %arg10: memref<8x128xf32, #tpu.memory_space<vmem>>, %arg11: memref<8x128xbf16, #tpu.memory_space<vmem>>) attributes {dimension_semantics = [#tpu.dimension_semantics<parallel>], iteration_bounds = array<i64: 1>, scalar_prefetch = 0 : i64, scratch_operands = 1 : i64, tpu.core_type = #tpu.core_type<tc>, window_params = [{transform_indices = @transform_0, window_bounds = array<i64: 8, 128>}, {pipeline_mode = #tpu.pipeline_mode<synchronous>, transform_indices = @transform_1, window_bounds = array<i64: 128, 128>}, {pipeline_mode = #tpu.pipeline_mode<synchronous>, transform_indices = @transform_2, window_bounds = array<i64: 1, 128>}, {pipeline_mode = #tpu.pipeline_mode<synchronous>, transform_indices = @transform_3, window_bounds = array<i64: 128, 128>}, {pipeline_mode = #tpu.pipeline_mode<synchronous>, transform_indices = @transform_4, window_bounds = array<i64: 1, 128>}, {pipeline_mode = #tpu.pipeline_mode<synchronous>, transform_indices = @transform_5, window_bounds = array<i64: 128, 128>}, {pipeline_mode = #tpu.pipeline_mode<synchronous>, transform_indices = @transform_6, window_bounds = array<i64: 1, 128>}, {pipeline_mode = #tpu.pipeline_mode<synchronous>, transform_indices = @transform_7, window_bounds = array<i64: 128, 128>}, {pipeline_mode = #tpu.pipeline_mode<synchronous>, transform_indices = @transform_8, window_bounds = array<i64: 1, 128>}, {transform_indices = @transform_9, window_bounds = array<i64: 8, 128>}]} {
    %c0 = arith.constant 0 : index
    %c0_0 = arith.constant 0 : index
    %0 = vector.load %arg1[%c0, %c0_0] : memref<8x128xbf16, #tpu.memory_space<vmem>>, vector<8x128xbf16>
    %c0_1 = arith.constant 0 : index
    %c0_2 = arith.constant 0 : index
    %1 = vector.load %arg2[%c0_1, %c0_2] : memref<128x128xbf16, #tpu.memory_space<vmem>>, vector<128x128xbf16>
    %cst = arith.constant dense<0.000000e+00> : vector<8x128xf32>
    %2 = tpu.matmul %0, %1, %cst {dimension_numbers = #tpu.dot_dimension_numbers<[1], [0], [0], [1], [0, 0, 1, 1], [], []>} : vector<8x128xbf16>, vector<128x128xbf16>, vector<8x128xf32> -> vector<8x128xf32>
    %c0_3 = arith.constant 0 : index
    %c0_4 = arith.constant 0 : index
    %3 = vector.load %arg3[%c0_3, %c0_4] : memref<1x128xf32, #tpu.memory_space<vmem>>, vector<1x128xf32>
    %4 = vector.broadcast %3 : vector<1x128xf32> to vector<8x128xf32>
    %5 = arith.addf %2, %4 : vector<8x128xf32>
    %cst_5 = arith.constant 0.000000e+00 : f32
    %6 = vector.broadcast %cst_5 : f32 to vector<8x128xf32>
    %7 = arith.maximumf %5, %6 : vector<8x128xf32>
    %8 = arith.truncf %7 : vector<8x128xf32> to vector<8x128xbf16>
    %c0_6 = arith.constant 0 : index
    %c0_7 = arith.constant 0 : index
    %9 = vector.load %arg11[%c0_6, %c0_7] : memref<8x128xbf16, #tpu.memory_space<vmem>>, vector<8x128xbf16>
    tpu.vector_store %arg11[%c0_6, %c0_7], %8 {strides = array<i32>} : memref<8x128xbf16, #tpu.memory_space<vmem>>, vector<8x128xbf16>,
    %c0_8 = arith.constant 0 : index
    %c0_9 = arith.constant 0 : index
    %10 = vector.load %arg11[%c0_8, %c0_9] : memref<8x128xbf16, #tpu.memory_space<vmem>>, vector<8x128xbf16>
    %c0_10 = arith.constant 0 : index
    %c0_11 = arith.constant 0 : index
    %11 = vector.load %arg4[%c0_10, %c0_11] : memref<128x128xbf16, #tpu.memory_space<vmem>>, vector<128x128xbf16>
    %cst_12 = arith.constant dense<0.000000e+00> : vector<8x128xf32>
    %12 = tpu.matmul %10, %11, %cst_12 {dimension_numbers = #tpu.dot_dimension_numbers<[1], [0], [0], [1], [0, 0, 1, 1], [], []>} : vector<8x128xbf16>, vector<128x128xbf16>, vector<8x128xf32> -> vector<8x128xf32>
    %c0_13 = arith.constant 0 : index
    %c0_14 = arith.constant 0 : index
    %13 = vector.load %arg5[%c0_13, %c0_14] : memref<1x128xf32, #tpu.memory_space<vmem>>, vector<1x128xf32>
    %14 = vector.broadcast %13 : vector<1x128xf32> to vector<8x128xf32>
    %15 = arith.addf %12, %14 : vector<8x128xf32>
    %cst_15 = arith.constant 0.000000e+00 : f32
    %16 = vector.broadcast %cst_15 : f32 to vector<8x128xf32>
    %17 = arith.maximumf %15, %16 : vector<8x128xf32>
    %18 = arith.truncf %17 : vector<8x128xf32> to vector<8x128xbf16>
    %c0_16 = arith.constant 0 : index
    %c0_17 = arith.constant 0 : index
    %19 = vector.load %arg11[%c0_16, %c0_17] : memref<8x128xbf16, #tpu.memory_space<vmem>>, vector<8x128xbf16>
    tpu.vector_store %arg11[%c0_16, %c0_17], %18 {strides = array<i32>} : memref<8x128xbf16, #tpu.memory_space<vmem>>, vector<8x128xbf16>,
    %c0_18 = arith.constant 0 : index
    %c0_19 = arith.constant 0 : index
    %20 = vector.load %arg11[%c0_18, %c0_19] : memref<8x128xbf16, #tpu.memory_space<vmem>>, vector<8x128xbf16>
    %c0_20 = arith.constant 0 : index
    %c0_21 = arith.constant 0 : index
    %21 = vector.load %arg6[%c0_20, %c0_21] : memref<128x128xbf16, #tpu.memory_space<vmem>>, vector<128x128xbf16>
    %cst_22 = arith.constant dense<0.000000e+00> : vector<8x128xf32>
    %22 = tpu.matmul %20, %21, %cst_22 {dimension_numbers = #tpu.dot_dimension_numbers<[1], [0], [0], [1], [0, 0, 1, 1], [], []>} : vector<8x128xbf16>, vector<128x128xbf16>, vector<8x128xf32> -> vector<8x128xf32>
    %c0_23 = arith.constant 0 : index
    %c0_24 = arith.constant 0 : index
    %23 = vector.load %arg7[%c0_23, %c0_24] : memref<1x128xf32, #tpu.memory_space<vmem>>, vector<1x128xf32>
    %24 = vector.broadcast %23 : vector<1x128xf32> to vector<8x128xf32>
    %25 = arith.addf %22, %24 : vector<8x128xf32>
    %cst_25 = arith.constant 0.000000e+00 : f32
    %26 = vector.broadcast %cst_25 : f32 to vector<8x128xf32>
    %27 = arith.maximumf %25, %26 : vector<8x128xf32>
    %28 = arith.truncf %27 : vector<8x128xf32> to vector<8x128xbf16>
    %c0_26 = arith.constant 0 : index
    %c0_27 = arith.constant 0 : index
    %29 = vector.load %arg11[%c0_26, %c0_27] : memref<8x128xbf16, #tpu.memory_space<vmem>>, vector<8x128xbf16>
    tpu.vector_store %arg11[%c0_26, %c0_27], %28 {strides = array<i32>} : memref<8x128xbf16, #tpu.memory_space<vmem>>, vector<8x128xbf16>,
    %c0_28 = arith.constant 0 : index
    %c0_29 = arith.constant 0 : index
    %30 = vector.load %arg11[%c0_28, %c0_29] : memref<8x128xbf16, #tpu.memory_space<vmem>>, vector<8x128xbf16>
    %c0_30 = arith.constant 0 : index
    %c0_31 = arith.constant 0 : index
    %31 = vector.load %arg8[%c0_30, %c0_31] : memref<128x128xbf16, #tpu.memory_space<vmem>>, vector<128x128xbf16>
    %cst_32 = arith.constant dense<0.000000e+00> : vector<8x128xf32>
    %32 = tpu.matmul %30, %31, %cst_32 {dimension_numbers = #tpu.dot_dimension_numbers<[1], [0], [0], [1], [0, 0, 1, 1], [], []>} : vector<8x128xbf16>, vector<128x128xbf16>, vector<8x128xf32> -> vector<8x128xf32>
    %c0_33 = arith.constant 0 : index
    %c0_34 = arith.constant 0 : index
    %33 = vector.load %arg9[%c0_33, %c0_34] : memref<1x128xf32, #tpu.memory_space<vmem>>, vector<1x128xf32>
    %34 = vector.broadcast %33 : vector<1x128xf32> to vector<8x128xf32>
    %35 = arith.addf %32, %34 : vector<8x128xf32>
    %c0_35 = arith.constant 0 : index
    %c0_36 = arith.constant 0 : index
    %36 = vector.load %arg10[%c0_35, %c0_36] : memref<8x128xf32, #tpu.memory_space<vmem>>, vector<8x128xf32>
    tpu.vector_store %arg10[%c0_35, %c0_36], %35 {strides = array<i32>} : memref<8x128xf32, #tpu.memory_space<vmem>>, vector<8x128xf32>,
    return
  }
  func.func @transform_0(%arg0: i32) -> (i32, i32) {
    %c0_i32 = arith.constant 0 : i32
    %c0_i32_0 = arith.constant 0 : i32
    return %arg0, %c0_i32 : i32, i32
  }
  func.func @transform_1(%arg0: i32) -> (i32, i32) {
    %c0_i32 = arith.constant 0 : i32
    %c0_i32_0 = arith.constant 0 : i32
    %c0_i32_1 = arith.constant 0 : i32
    return %c0_i32, %c0_i32_0 : i32, i32
  }
  func.func @transform_2(%arg0: i32) -> (i32, i32) {
    %c0_i32 = arith.constant 0 : i32
    %c0_i32_0 = arith.constant 0 : i32
    %c0_i32_1 = arith.constant 0 : i32
    return %c0_i32, %c0_i32_0 : i32, i32
  }
  func.func @transform_3(%arg0: i32) -> (i32, i32) {
    %c0_i32 = arith.constant 0 : i32
    %c0_i32_0 = arith.constant 0 : i32
    %c0_i32_1 = arith.constant 0 : i32
    return %c0_i32, %c0_i32_0 : i32, i32
  }
  func.func @transform_4(%arg0: i32) -> (i32, i32) {
    %c0_i32 = arith.constant 0 : i32
    %c0_i32_0 = arith.constant 0 : i32
    %c0_i32_1 = arith.constant 0 : i32
    return %c0_i32, %c0_i32_0 : i32, i32
  }
  func.func @transform_5(%arg0: i32) -> (i32, i32) {
    %c0_i32 = arith.constant 0 : i32
    %c0_i32_0 = arith.constant 0 : i32
    %c0_i32_1 = arith.constant 0 : i32
    return %c0_i32, %c0_i32_0 : i32, i32
  }
  func.func @transform_6(%arg0: i32) -> (i32, i32) {
    %c0_i32 = arith.constant 0 : i32
    %c0_i32_0 = arith.constant 0 : i32
    %c0_i32_1 = arith.constant 0 : i32
    return %c0_i32, %c0_i32_0 : i32, i32
  }
  func.func @transform_7(%arg0: i32) -> (i32, i32) {
    %c0_i32 = arith.constant 0 : i32
    %c0_i32_0 = arith.constant 0 : i32
    %c0_i32_1 = arith.constant 0 : i32
    return %c0_i32, %c0_i32_0 : i32, i32
  }
  func.func @transform_8(%arg0: i32) -> (i32, i32) {
    %c0_i32 = arith.constant 0 : i32
    %c0_i32_0 = arith.constant 0 : i32
    %c0_i32_1 = arith.constant 0 : i32
    return %c0_i32, %c0_i32_0 : i32, i32
  }
  func.func @transform_9(%arg0: i32) -> (i32, i32) {
    %c0_i32 = arith.constant 0 : i32
    %c0_i32_0 = arith.constant 0 : i32
    return %arg0, %c0_i32 : i32, i32
  }
}

</mosaic_0001>

<bundles_post_ra>
// kernel: tpu_custom_call.1
= control target key start
LH: loop header
LB: loop body
LE: loop exit
PB: predicated region body
PF: predicated region fallthrough
CT: control target
= control target key end

     0   :  { %14 = vsyncpa [#allocation4], 0  ;;  %s878_s0 = inlined_call_operand.hbm [shape: bf16[8,128], index: 0, kind: input, shape index: {}]   ;;  %s879_s1 = inlined_call_operand.hbm [shape: bf16[128,128], index: 1, kind: input, shape index: {}]   ;;  %s880_s2 = inlined_call_operand.vmem [shape: f32[1,128], index: 2, kind: input, shape index: {}]   ;;  %s881_s3 = inlined_call_operand.hbm [shape: bf16[128,128], index: 3, kind: input, shape index: {}]   ;;  %s882_s4 = inlined_call_operand.vmem [shape: f32[1,128], index: 4, kind: input, shape index: {}]   ;;  %s883_s5 = inlined_call_operand.hbm [shape: bf16[128,128], index: 5, kind: input, shape index: {}]   ;;  %s884_s6 = inlined_call_operand.vmem [shape: f32[1,128], index: 6, kind: input, shape index: {}]   ;;  %s885_s7 = inlined_call_operand.hbm [shape: bf16[128,128], index: 7, kind: input, shape index: {}]   ;;  %s886_s8 = inlined_call_operand.vmem [shape: f32[1,128], index: 8, kind: input, shape index: {}]   ;;  %s887_s9 = inlined_call_operand.hbm [shape: f32[8,128], index: 9, kind: output, shape index: {}]  }
   0x1   :  { %15 = vsyncpa [#allocation7], 0 }
   0x2   :  { %16 = vsyncpa [#allocation10], 0  ;;  %s33_s11 = sshll.u32 %s879_s1, 4  ;;  %s34_s11 = int_to_ptr.hbm [resolvable:$true] %s33_s11 }
   0x3   :  { %17 = vsyncpa [#allocation5], 0  ;;  %s790_s12 = smov [#allocation6]   ;;  %s63_s16 = sshll.u32 %s883_s5, 4  ;;  %s64_s16 = int_to_ptr.hbm [resolvable:$true] %s63_s16 }
   0x4   :  { %s35_s13 = sshll.u32 %s790_s12, 4  ;;  %s791_s17 = smov 64   ;;  %s36_s13 = int_to_ptr.vmem [resolvable:$true] %s35_s13 }
   0x5   :  { %s792_s18 = smov 4   ;;  %s793_s19 = smov [#allocation9]  }
   0x6   :  { %41 = dma.hbm_to_vmem [thread:$0]  %s34_s11, 1024, %s36_s13, [#allocation7], %s791_s17, %s791_s17, %s792_s18  }
   0x7   :  { %s65_s20 = sshll.u32 %s793_s19, 4  ;;  %s23_s23 = sshll.u32 %s878_s0, 4  ;;  %s66_s20 = int_to_ptr.vmem [resolvable:$true] %s65_s20  ;;  %s24_s23 = int_to_ptr.hbm [resolvable:$true] %s23_s23 }
   0x8   :  { %71 = dma.hbm_to_vmem [thread:$0]  %s64_s16, 1024, %s66_s20, [#allocation10], %s791_s17, %s791_s17, %s792_s18  }
   0x9   :  { %s48_s25 = sshll.u32 %s881_s3, 4  ;;  %s794_s26 = smov [#allocation3]   ;;  %s49_s25 = int_to_ptr.hbm [resolvable:$true] %s48_s25 }
   0xa   :  { %s25_s27 = sshll.u32 %s794_s26, 4  ;;  %s795_s5 = smov [#allocation8]   ;;  %s26_s27 = int_to_ptr.vmem [resolvable:$true] %s25_s27 }
   0xb   :  { %28 = dma.hbm_to_vmem [thread:$0]  %s24_s23, 64, %s26_s27, [#allocation4]  }
   0xc   :  { %s50_s28 = sshll.u32 %s795_s5, 4  ;;  %s78_s10 = sshll.u32 %s885_s7, 4  ;;  %s51_s28 = int_to_ptr.vmem [resolvable:$true] %s50_s28  ;;  %s79_s10 = int_to_ptr.hbm [resolvable:$true] %s78_s10 }
   0xd   :  { %56 = dma.hbm_to_vmem [thread:$0]  %s49_s25, 1024, %s51_s28, [#allocation7], %s791_s17, %s791_s17, %s792_s18  }
   0xe   :  { %s796_s0 = smov [#allocation11]  }
   0xf   :  { %s80_s11 = sshll.u32 %s796_s0, 4  ;;  %s81_s11 = int_to_ptr.vmem [resolvable:$true] %s80_s11 }
  0x10   :  { %86 = dma.hbm_to_vmem [thread:$0]  %s79_s10, 1024, %s81_s11, [#allocation10], %s791_s17, %s791_s17, %s792_s18  }
  0x11   :  { %782 = dma.done.wait [#allocation4], 64  }
  0x12   :  { %783 = vsyncadd [#allocation4], 4294967232 }
  0x13   :  { %784 = dma.done.wait [#allocation7], 2048  }
  0x14   :  { %785 = vsyncadd [#allocation7], 4294965248 }
  0x15   :  { %786 = dma.done.wait [#allocation10], 2048  }
  0x16   :  { %787 = vsyncadd [#allocation10], 4294965248  ;;  %v601_v0 = vld [vmem:[#allocation6 + $0x38] sm:$0xff]  ;;  %v600_v1 = vld [vmem:[#allocation6 + $0x30] sm:$0xff]  ;;  %s797_s16 = smov [#allocation12]   ;;  %s454_s20 = sshll.u32 %s887_s9, 4  ;;  %s455_s20 = int_to_ptr.hbm [resolvable:$true] %s454_s20 }
  0x17   :  { %178 = vmatpush.bf16.msra.mxu0 %v601_v0  ;;  %v609_v2 = vld [vmem:[#allocation8 + $0x38] sm:$0xff]  ;;  %v608_v3 = vld [vmem:[#allocation8 + $0x30] sm:$0xff]  ;;  %v599_v4 = vld [vmem:[#allocation6 + $0x28] sm:$0xff]  ;;  %s452_s17 = sshll.u32 %s797_s16, 4  ;;  %s453_s17 = int_to_ptr.vmem [resolvable:$true] %s452_s17 }
  0x18   :  { %263 = vmatpush.bf16.msra.mxu1 %v609_v2  ;;  %v607_v5 = vld [vmem:[#allocation8 + $0x28] sm:$0xff]  ;;  %v598_v6 = vld [vmem:[#allocation6 + $0x20] sm:$0xff]  ;;  %v597_v8 = vld [vmem:[#allocation6 + $0x18] sm:$0xff] }
  0x19   :  { %v606_v7 = vld [vmem:[#allocation8 + $0x20] sm:$0xff]  ;;  %v596_v9 = vld [vmem:[#allocation6 + $0x10] sm:$0xff]  ;;  %v595_v10 = vld [vmem:[#allocation6 + $0x8] sm:$0xff] }
  0x1a   :  { %v594_v11 = vld [vmem:[#allocation6] sm:$0xff]  ;;  %v109_v12 = vld [vmem:[#allocation3] sm:$0xf]  ;;  %v604_v14 = vld [vmem:[#allocation8 + $0x10] sm:$0xff] }
  0x1b   :  { %179 = vmatpush.bf16.msra.mxu0 %v600_v1  ;;  %v605_v13 = vld [vmem:[#allocation8 + $0x18] sm:$0xff]  ;;  %v603_v15 = vld [vmem:[#allocation8 + $0x8] sm:$0xff]  ;;  %v602_v16 = vld [vmem:[#allocation8] sm:$0xff] }
  0x1c   :  { %264 = vmatpush.bf16.msra.mxu1 %v608_v3  ;;  %v617_v17 = vld [vmem:[#allocation9 + $0x38] sm:$0xff]  ;;  %v616_v18 = vld [vmem:[#allocation9 + $0x30] sm:$0xff]  ;;  %v615_v19 = vld [vmem:[#allocation9 + $0x28] sm:$0xff] }
  0x1d   :  { %348 = vmatpush.bf16.msra.mxu2 %v617_v17  ;;  %v614_v20 = vld [vmem:[#allocation9 + $0x20] sm:$0xff]  ;;  %v634_v21 = vld [vmem:[%s880_s2] ss:$0 sm:$0xff]  ;;  %v612_v29 = vld [vmem:[#allocation9 + $0x10] sm:$0xff] }
  0x1e   :  { %v613_v28 = vld [vmem:[#allocation9 + $0x18] sm:$0xff]  ;;  %v611_v30 = vld [vmem:[#allocation9 + $0x8] sm:$0xff]  ;;  %v610_v31 = vld [vmem:[#allocation9] sm:$0xff] }
  0x1f   :  { %180 = vmatpush.bf16.msra.mxu0 %v599_v4  ;;  %v625_v32 = vld [vmem:[#allocation11 + $0x38] sm:$0xff]  ;;  %v624_v33 = vld [vmem:[#allocation11 + $0x30] sm:$0xff]  ;;  %v623_v34 = vld [vmem:[#allocation11 + $0x28] sm:$0xff] }
  0x20   :  { %265 = vmatpush.bf16.msra.mxu1 %v607_v5  ;;  %433 = vmatpush.bf16.msra.mxu3 %v625_v32  ;;  %v622_v35 = vld [vmem:[#allocation11 + $0x20] sm:$0xff]  ;;  %v635_v36 = vld [vmem:[%s882_s4] ss:$0 sm:$0xff]  ;;  %v620_v44 = vld [vmem:[#allocation11 + $0x10] sm:$0xff] }
  0x21   :  { %349 = vmatpush.bf16.msra.mxu2 %v616_v18  ;;  %v621_v43 = vld [vmem:[#allocation11 + $0x18] sm:$0xff]  ;;  %v619_v45 = vld [vmem:[#allocation11 + $0x8] sm:$0xff]  ;;  %v618_v46 = vld [vmem:[#allocation11] sm:$0xff] }
  0x22   :  { %v636_v47 = vld [vmem:[%s884_s6] ss:$0 sm:$0xff] }
  0x23   :  { %181 = vmatpush.bf16.msra.mxu0 %v598_v6  ;;  %v637_v54 = vld [vmem:[%s886_s8] ss:$0 sm:$0xff] }
  0x24   :  { %266 = vmatpush.bf16.msra.mxu1 %v606_v7  ;;  %434 = vmatpush.bf16.msra.mxu3 %v624_v33 }
  0x25   :  { %350 = vmatpush.bf16.msra.mxu2 %v615_v19 }
  0x27   :  { %182 = vmatpush.bf16.msra.mxu0 %v597_v8 }
  0x28   :  { %267 = vmatpush.bf16.msra.mxu1 %v605_v13  ;;  %435 = vmatpush.bf16.msra.mxu3 %v623_v34 }
  0x29   :  { %351 = vmatpush.bf16.msra.mxu2 %v614_v20 }
  0x2b   :  { %183 = vmatpush.bf16.msra.mxu0 %v596_v9 }
  0x2c   :  { %268 = vmatpush.bf16.msra.mxu1 %v604_v14  ;;  %436 = vmatpush.bf16.msra.mxu3 %v622_v35 }
  0x2d   :  { %352 = vmatpush.bf16.msra.mxu2 %v613_v28 }
  0x2f   :  { %184 = vmatpush.bf16.msra.mxu0 %v595_v10 }
  0x30   :  { %269 = vmatpush.bf16.msra.mxu1 %v603_v15  ;;  %437 = vmatpush.bf16.msra.mxu3 %v621_v43 }
  0x31   :  { %353 = vmatpush.bf16.msra.mxu2 %v612_v29 }
  0x33   :  { %185 = vmatpush.bf16.msra.mxu0 %v594_v11 }
  0x34   :  { %270 = vmatpush.bf16.msra.mxu1 %v602_v16  ;;  %438 = vmatpush.bf16.msra.mxu3 %v620_v44 }
  0x35   :  { %354 = vmatpush.bf16.msra.mxu2 %v611_v30 }
  0x36   :  { %186 = vmatmul.bf16.vlgmr.msra.gmra.mxu0 %v109_v12 }
  0x38   :  { %439 = vmatpush.bf16.msra.mxu3 %v619_v45 }
  0x39   :  { %355 = vmatpush.bf16.msra.mxu2 %v610_v31 }
  0x3c   :  { %440 = vmatpush.bf16.msra.mxu3 %v618_v46 }
  0xb3   :  { %v187_v22 = vpop.f32.mrf.mxu0 }
  0xb4   :  { %v188_v23 = vadd.f32 %v634_v21, %v187_v22 }
  0xb6   :  { %v191_v24 = vmax.f32 %v188_v23, 0.0 }
  0xb8   :  { %v192_v25 = vpack.c.bf16 %v191_v24, %v191_v24 }
  0xba   :  { %193 = vst [vmem:[#allocation2] sm:$0xf] %v192_v25 }
  0xbb   :  { %v189_v26 = vpop.f32.mrf.mxu0 }
  0xc1   :  { %v194_v27 = vld [vmem:[#allocation2] sm:$0xf] }
  0xc2   :  { %271 = vmatmul.bf16.vlgmr.msra.gmra.mxu1 %v194_v27 }
 0x13f   :  { %v272_v37 = vpop.f32.mrf.mxu1 }
 0x140   :  { %v273_v38 = vadd.f32 %v635_v36, %v272_v37 }
 0x142   :  { %v276_v39 = vmax.f32 %v273_v38, 0.0 }
 0x144   :  { %v277_v40 = vpack.c.bf16 %v276_v39, %v276_v39 }
 0x146   :  { %278 = vst [vmem:[#allocation2] sm:$0xf] %v277_v40 }
 0x147   :  { %v274_v41 = vpop.f32.mrf.mxu1 }
 0x14d   :  { %v279_v42 = vld [vmem:[#allocation2] sm:$0xf] }
 0x14e   :  { %356 = vmatmul.bf16.vlgmr.msra.gmra.mxu2 %v279_v42 }
 0x1d1   :  { %v357_v48 = vpop.f32.mrf.mxu2 }
 0x1d2   :  { %v358_v49 = vadd.f32 %v636_v47, %v357_v48 }
 0x1d4   :  { %v361_v50 = vmax.f32 %v358_v49, 0.0 }
 0x1d6   :  { %v362_v51 = vpack.c.bf16 %v361_v50, %v361_v50 }
 0x1d8   :  { %363 = vst [vmem:[#allocation2] sm:$0xf] %v362_v51 }
 0x1d9   :  { %v359_v52 = vpop.f32.mrf.mxu2 }
 0x1df   :  { %v364_v53 = vld [vmem:[#allocation2] sm:$0xf] }
 0x1e0   :  { %441 = vmatmul.bf16.vlgmr.msra.gmra.mxu3 %v364_v53 }
 0x263   :  { %v442_v55 = vpop.f32.mrf.mxu3 }
 0x264   :  { %v443_v56 = vadd.f32 %v637_v54, %v442_v55 }
 0x266   :  { %446 = vst [vmem:[#allocation12] sm:$0xff] %v443_v56 }
 0x267   :  { %457 = dma.vmem_to_hbm [thread:$0]  %s453_s17, 128, %s455_s20, [#allocation5]  }
 0x26b   :  { %v444_v57 = vpop.f32.mrf.mxu3 }
 0x26c   :  { %788 = dma.done.wait [#allocation5], 128  }
 0x26d   :  { %789 = vsyncadd [#allocation5], 4294967168 }
 0x26e   :  { %462 = vsyncpa [#allocation4], 1 }
 0x26f   :  { %463 = vsyncpa [#allocation7], 1 }
 0x270   :  { %464 = vsyncpa [#allocation10], 1 }
 0x271   :  { %465 = vsyncpa [#allocation5], 1 }

</bundles_post_ra>
